<compile_context>
chip_gen: v5e
topology: v5e:2x2
jax: 0.10.0
libtpu: 0.0.40
codegen_flags: <defaults>
</compile_context>

<pallas_src>
import functools
import math

import jax
import jax.numpy as jnp
from jax import lax
from jax.experimental import pallas as pl
from jax.experimental.pallas import tpu as pltpu

_LANE = 128
_TILE_CAP = 512                       # per-axis tile cap (bytes stay tiny vs VMEM)
_FAST_PATH_ELEMS = 128 * 128 * 128    # below this, plain jnp.dot beats a kernel launch


def _round_up(x, m):
    return ((x + m - 1) // m) * m


def _cdiv(a, b):
    return -(-a // b)


def _pick_tile(dim, align, cap=_TILE_CAP):
    """Divisor-aware tile choice.

    (a) whole (aligned) dim if it fits under `cap`; else
    (b) largest aligned tile in [cap/2, cap] dividing the aligned dim exactly
        (zero padding); else
    (c) evenly-split tiles so padding is at most one `align` unit per tile.
    """
    d = _round_up(dim, align)
    if d <= cap:
        return d
    t = (cap // align) * align
    while t >= max(align, cap // 2):
        if d % t == 0:
            return t
        t -= align
    n_tiles = _cdiv(d, cap)
    return _round_up(_cdiv(d, n_tiles), align)


def _vmem_limit_bytes():
    # v5e/v6e: 128 MiB physical VMEM -> allow up to 96 MiB scoped.
    # v7x:      64 MiB per TensorCore -> stay at ~48 MiB.
    cap = 64 * 1024 * 1024
    try:
        cap = getattr(pltpu.get_tpu_info(), "vmem_capacity_bytes", cap)
    except Exception:
        pass
    return int(min(96 * 1024 * 1024, (cap * 3) // 4))


def _linear_kernel_f32_out(x_ref, w_ref, b_ref, o_ref):
    # f32 output: the (i, j) output block keeps the same index across the k
    # axis, so it stays resident in VMEM -- accumulate directly into it.
    # Initializing with the broadcast bias at k==0 removes the epilogue copy
    # entirely while still adding the bias exactly once.
    @pl.when(pl.program_id(2) == 0)
    def _():
        o_ref[...] = jnp.broadcast_to(b_ref[...].astype(jnp.float32), o_ref.shape)

    # NT contraction against the PyTorch [out, in] layout: Mosaic lowers this
    # straight to an MXU matmul (no XLU transpose of the weight tile).
    o_ref[...] += lax.dot_general(
        x_ref[...], w_ref[...],
        dimension_numbers=(((1,), (1,)), ((), ())),
        preferred_element_type=jnp.float32,
    )


def _linear_kernel_scratch(x_ref, w_ref, b_ref, o_ref, acc_ref):
    # Non-f32 output: accumulate in an f32 VMEM scratch, cast once at the end.
    k = pl.program_id(2)

    @pl.when(k == 0)
    def _():
        acc_ref[...] = jnp.broadcast_to(b_ref[...].astype(jnp.float32), acc_ref.shape)

    acc_ref[...] += lax.dot_general(
        x_ref[...], w_ref[...],
        dimension_numbers=(((1,), (1,)), ((), ())),
        preferred_element_type=jnp.float32,
    )

    @pl.when(k == pl.num_programs(2) - 1)
    def _():
        o_ref[...] = acc_ref[...].astype(o_ref.dtype)


@functools.partial(
    jax.jit,
    static_argnames=("out_dim", "tile_b", "tile_n", "tile_k", "compute_dtype",
                     "use_kernel"),
)
def linear_readout(x, weight, bias, *, out_dim=None, tile_b=None, tile_n=None,
                   tile_k=None, compute_dtype=jnp.bfloat16, use_kernel=None):
    """Pallas equivalent of nn.Linear(in_dim, out_dim).forward.

    x:      [B, in_dim]
    weight: [out_dim(_padded), in_dim(_padded)]  (PyTorch layout, used as-is)
    bias:   [out_dim(_padded)]
    out_dim: true output width when weight/bias were pre-padded via
             prepare_linear_readout_params; defaults to weight.shape[0].
    compute_dtype: MXU operand dtype (accumulation is always f32). bf16 by
             default; jnp.float32 for exact f32 numerics; None -> x.dtype.
    returns [B, out_dim] in x.dtype.
    """
    B, K_x = x.shape
    N_w, K_w = weight.shape
    if K_w < K_x:
        raise ValueError("weight in_dim smaller than x in_dim")
    out_dim = N_w if out_dim is None else out_dim
    out_dtype = x.dtype

    cdt = jnp.dtype(x.dtype if compute_dtype is None else compute_dtype)
    # Only emit casts when actually needed (pre-cast weights make this free).
    if x.dtype != cdt:
        x = x.astype(cdt)
    if weight.dtype != cdt:
        weight = weight.astype(cdt)

    if use_kernel is None:
        use_kernel = (B * N_w * K_w) >= _FAST_PATH_ELEMS
    if not use_kernel:
        # Sub-vreg problems: a kernel launch + pad/slice copies cost more than
        # the matmul itself.
        if K_w != K_x:
            x = jnp.pad(x, ((0, 0), (0, K_w - K_x)))
        y = jnp.dot(x, weight.T, preferred_element_type=jnp.float32)
        y = (y + bias.reshape(1, -1).astype(jnp.float32)).astype(out_dtype)
        return y[:, :out_dim]

    sub = max(8, 32 // cdt.itemsize)          # sublane granule for compute dtype

    if tile_b is None:
        tile_b = _pick_tile(B, sub)
    if tile_n is None:
        tile_n = _pick_tile(N_w, _LANE)       # lane-dense output (multiple of 128)
    if tile_k is None:
        tile_k = _pick_tile(K_w, _LANE)

    B_pad = _round_up(B, tile_b)
    N_pad = _round_up(N_w, tile_n)
    K_pad = _round_up(K_w, tile_k)

    # v7x: 2 TensorCores shard the "parallel" (i, j) axes -- ensure >= 2
    # blocks when possible without introducing extra padding.
    if (B_pad // tile_b) * (N_pad // tile_n) < 2:
        cand = ((N_pad // 2) // _LANE) * _LANE
        while cand >= _LANE and N_pad % cand:
            cand -= _LANE
        if cand >= _LANE:
            tile_n = cand

    # Zero-pad up to tile multiples (exact for the K reduction; padded B/N
    # rows/cols are sliced off below).  Pads are emitted only when needed.
    if (B_pad, K_pad) != (B, K_x):
        x = jnp.pad(x, ((0, B_pad - B), (0, K_pad - K_x)))
    if (N_pad, K_pad) != (N_w, K_w):
        weight = jnp.pad(weight, ((0, N_pad - N_w), (0, K_pad - K_w)))
    b2d = bias.reshape(1, -1)                 # bias stays in its own (f32) dtype
    if b2d.shape[1] != N_pad:
        b2d = jnp.pad(b2d, ((0, 0), (0, N_pad - b2d.shape[1])))

    grid = (B_pad // tile_b, N_pad // tile_n, K_pad // tile_k)

    f32_out = jnp.dtype(out_dtype) == jnp.float32
    kernel = _linear_kernel_f32_out if f32_out else _linear_kernel_scratch
    scratch = () if f32_out else (pltpu.VMEM((tile_b, tile_n), jnp.float32),)

    out = pl.pallas_call(
        kernel,
        out_shape=jax.ShapeDtypeStruct((B_pad, N_pad), out_dtype),
        grid_spec=pltpu.PrefetchScalarGridSpec(
            num_scalar_prefetch=0,
            grid=grid,
            in_specs=[
                pl.BlockSpec((tile_b, tile_k), lambda i, j, k: (i, k)),  # x
                pl.BlockSpec((tile_n, tile_k), lambda i, j, k: (j, k)),  # W [out,in]
                pl.BlockSpec((1, tile_n), lambda i, j, k: (0, j)),       # bias
            ],
            out_specs=pl.BlockSpec((tile_b, tile_n), lambda i, j, k: (i, j)),
            scratch_shapes=scratch,
        ),
        compiler_params=pltpu.CompilerParams(
            dimension_semantics=("parallel", "parallel", "arbitrary"),
            vmem_limit_bytes=_vmem_limit_bytes(),
        ),
        cost_estimate=pl.CostEstimate(
            flops=2 * B_pad * N_pad * K_pad,
            transcendentals=0,
            bytes_accessed=(x.size * x.dtype.itemsize
                            + weight.size * weight.dtype.itemsize
                            + B_pad * N_pad * jnp.dtype(out_dtype).itemsize),
        ),
    )(x, weight, b2d)

    if (B_pad, N_pad) != (B, out_dim):
        out = out[:B, :out_dim]
    return out


def prepare_linear_readout_params(weight, bias, *, compute_dtype=jnp.bfloat16,
                                  align_n=_LANE, align_k=_LANE):
    """One-time (off the hot path) cast + pad of the static Linear params so
    repeated linear_readout calls emit no weight-sized astype/pad HBM copies.

    Returns (weight_prepared, bias_prepared, out_dim); pass out_dim back to
    linear_readout so padded output columns are sliced off.
    """
    out_dim, in_dim = weight.shape
    n_pad = _round_up(out_dim, align_n)
    k_pad = _round_up(in_dim, align_k)
    w = weight if compute_dtype is None else weight.astype(compute_dtype)
    if (n_pad, k_pad) != (out_dim, in_dim):
        w = jnp.pad(w, ((0, n_pad - out_dim), (0, k_pad - in_dim)))
    b = bias
    if n_pad != out_dim:
        b = jnp.pad(b, (0, n_pad - out_dim))
    return w, b, out_dim


def init_linear_readout_params(key, in_dim, out_dim, dtype=jnp.float32):
    """Matches nn.Linear init + nn.init.xavier_uniform_(weight)."""
    k_w, k_b = jax.random.split(key)
    a = math.sqrt(6.0 / (in_dim + out_dim))          # xavier_uniform_
    weight = jax.random.uniform(k_w, (out_dim, in_dim), dtype, minval=-a, maxval=a)
    bound = 1.0 / math.sqrt(in_dim)                  # nn.Linear default bias init
    bias = jax.random.uniform(k_b, (out_dim,), dtype, minval=-bound, maxval=bound)
    return weight, bias


if __name__ == "__main__":
    key = jax.random.PRNGKey(0)
    k_x, k_p, k_x2, k_p2 = jax.random.split(key, 4)

    # --- small demo matching the module's shapes (forced through the kernel;
    #     the auto fast-path would route shapes this tiny to plain jnp.dot) ---
    batch, in_dim, hidden_dim, out_dim = 8, 32, 64, 16   # hidden_dim unused in fwd
    x = jax.random.normal(k_x, (batch, in_dim), dtype=jnp.float32)
    weight, bias = init_linear_readout_params(k_p, in_dim, out_dim)

    # Exact f32 numerics (compute_dtype=f32), f32-out accumulate-into-o_ref path.
    y = linear_readout(x, weight, bias, compute_dtype=jnp.float32, use_kernel=True)
    jax.block_until_ready(y)
    y_ref = x @ weight.T + bias
    assert y.shape == (batch, out_dim)
    assert jnp.allclose(y, y_ref, atol=1e-5, rtol=1e-5)

    # Default bf16-operand / f32-accumulate path (recommended on v5e/v6e/v7x).
    y_bf = linear_readout(x, weight, bias, use_kernel=True)
    jax.block_until_ready(y_bf)
    ref_bf = (jnp.dot(x.astype(jnp.bfloat16), weight.astype(jnp.bfloat16).T,
                      preferred_element_type=jnp.float32) + bias)
    assert jnp.allclose(y_bf, ref_bf, atol=5e-2, rtol=5e-2)

    # bf16 output -> exercises the scratch-accumulator kernel variant.
    y_b16 = linear_readout(x.astype(jnp.bfloat16), weight, bias, use_kernel=True)
    jax.block_until_ready(y_b16)
    assert y_b16.dtype == jnp.bfloat16 and y_b16.shape == (batch, out_dim)
    assert jnp.allclose(y_b16.astype(jnp.float32), ref_bf, atol=1e-1, rtol=1e-1)

    # --- larger case: non-pow2 N, multi-block parallel grid, pre-prepared
    #     (pre-cast + pre-padded) weights so the hot call has zero extra
    #     weight-sized HBM copies --------------------------------------------
    B2, in2, out2 = 384, 512, 384
    x2 = jax.random.normal(k_x2, (B2, in2), dtype=jnp.float32)
    w2, b2 = init_linear_readout_params(k_p2, in2, out2)
    w2p, b2p, out2_true = prepare_linear_readout_params(w2, b2)

    y2 = linear_readout(x2, w2p, b2p, out_dim=out2_true)
    jax.block_until_ready(y2)
    y2_ref = (jnp.dot(x2.astype(jnp.bfloat16), w2.astype(jnp.bfloat16).T,
                      preferred_element_type=jnp.float32) + b2)
    assert y2.shape == (B2, out2)
    assert jnp.allclose(y2, y2_ref, atol=5e-2, rtol=5e-2)

    print("KERNEL_OK")
</pallas_src>

<mosaic_0001>
module attributes {stable_mosaic.version = 11 : i64} {
  func.func @_linear_kernel_f32_out(%arg0: i32, %arg1: i32, %arg2: i32, %arg3: memref<8x128xf32, #tpu.memory_space<vmem>>, %arg4: memref<128x128xf32, #tpu.memory_space<vmem>>, %arg5: memref<1x128xf32, #tpu.memory_space<vmem>>, %arg6: memref<8x128xf32, #tpu.memory_space<vmem>>) attributes {dimension_semantics = [#tpu.dimension_semantics<parallel>, #tpu.dimension_semantics<parallel>, #tpu.dimension_semantics<arbitrary>], iteration_bounds = array<i64: 1, 1, 1>, scalar_prefetch = 0 : i64, scratch_operands = 0 : i64, tpu.core_type = #tpu.core_type<tc>, window_params = [{transform_indices = @transform_0, window_bounds = array<i64: 8, 128>}, {transform_indices = @transform_1, window_bounds = array<i64: 128, 128>}, {transform_indices = @transform_2, window_bounds = array<i64: 1, 128>}, {transform_indices = @transform_3, window_bounds = array<i64: 8, 128>}]} {
    %c0_i32 = arith.constant 0 : i32
    %0 = arith.cmpi eq, %arg2, %c0_i32 : i32
    %1 = arith.extui %0 : i1 to i32
    %c0_i32_0 = arith.constant 0 : i32
    %2 = arith.cmpi ne, %1, %c0_i32_0 : i32
    scf.if %2 {
      %c0_8 = arith.constant 0 : index
      %c0_9 = arith.constant 0 : index
      %9 = vector.load %arg5[%c0_8, %c0_9] : memref<1x128xf32, #tpu.memory_space<vmem>>, vector<1x128xf32>
      %10 = vector.shape_cast %9 : vector<1x128xf32> to vector<1x128xf32>
      %11 = vector.broadcast %10 : vector<1x128xf32> to vector<8x128xf32>
      %c0_10 = arith.constant 0 : index
      %c0_11 = arith.constant 0 : index
      %12 = vector.load %arg6[%c0_10, %c0_11] : memref<8x128xf32, #tpu.memory_space<vmem>>, vector<8x128xf32>
      tpu.vector_store %arg6[%c0_10, %c0_11], %11 {strides = array<i32>} : memref<8x128xf32, #tpu.memory_space<vmem>>, vector<8x128xf32>,
    } else {
    }
    %c0 = arith.constant 0 : index
    %c0_1 = arith.constant 0 : index
    %3 = vector.load %arg6[%c0, %c0_1] : memref<8x128xf32, #tpu.memory_space<vmem>>, vector<8x128xf32>
    %c0_2 = arith.constant 0 : index
    %c0_3 = arith.constant 0 : index
    %4 = vector.load %arg3[%c0_2, %c0_3] : memref<8x128xf32, #tpu.memory_space<vmem>>, vector<8x128xf32>
    %c0_4 = arith.constant 0 : index
    %c0_5 = arith.constant 0 : index
    %5 = vector.load %arg4[%c0_4, %c0_5] : memref<128x128xf32, #tpu.memory_space<vmem>>, vector<128x128xf32>
    %cst = arith.constant dense<0.000000e+00> : vector<8x128xf32>
    %6 = tpu.matmul %4, %5, %cst {dimension_numbers = #tpu.dot_dimension_numbers<[1], [1], [0], [0], [0, 0, 1, 0], [], []>} : vector<8x128xf32>, vector<128x128xf32>, vector<8x128xf32> -> vector<8x128xf32>
    %7 = arith.addf %3, %6 : vector<8x128xf32>
    %c0_6 = arith.constant 0 : index
    %c0_7 = arith.constant 0 : index
    %8 = vector.load %arg6[%c0_6, %c0_7] : memref<8x128xf32, #tpu.memory_space<vmem>>, vector<8x128xf32>
    tpu.vector_store %arg6[%c0_6, %c0_7], %7 {strides = array<i32>} : memref<8x128xf32, #tpu.memory_space<vmem>>, vector<8x128xf32>,
    return
  }
  func.func @transform_0(%arg0: i32, %arg1: i32, %arg2: i32) -> (i32, i32) {
    %c0_i32 = arith.constant 0 : i32
    return %arg0, %arg2 : i32, i32
  }
  func.func @transform_1(%arg0: i32, %arg1: i32, %arg2: i32) -> (i32, i32) {
    %c0_i32 = arith.constant 0 : i32
    return %arg1, %arg2 : i32, i32
  }
  func.func @transform_2(%arg0: i32, %arg1: i32, %arg2: i32) -> (i32, i32) {
    %c0_i32 = arith.constant 0 : i32
    %c0_i32_0 = arith.constant 0 : i32
    return %c0_i32, %arg1 : i32, i32
  }
  func.func @transform_3(%arg0: i32, %arg1: i32, %arg2: i32) -> (i32, i32) {
    %c0_i32 = arith.constant 0 : i32
    return %arg0, %arg1 : i32, i32
  }
}

</mosaic_0001>

<bundles_post_ra>
// kernel: linear_readout.1
= control target key start
LH: loop header
LB: loop body
LE: loop exit
PB: predicated region body
PF: predicated region fallthrough
CT: control target
= control target key end

     0   :  { %s186_s0 = inlined_call_operand.vmem [shape: f32[8,128], index: 0, kind: input, shape index: {}]   ;;  %s187_s1 = inlined_call_operand.vmem [shape: f32[128,128], index: 1, kind: input, shape index: {}]   ;;  %s188_s2 = inlined_call_operand.vmem [shape: f32[1,128], index: 2, kind: input, shape index: {}]   ;;  %s189_s3 = inlined_call_operand.hbm [shape: f32[8,128], index: 3, kind: output, shape index: {}]  }
   0x1   :  { %v41_v0 = vld [vmem:[%s187_s1 + $0x78] sm:$0xff]  ;;  %v40_v1 = vld [vmem:[%s187_s1 + $0x70] sm:$0xff] }
   0x2   :  { %42 = vmatpush.xpose.msra.mxu0 %v41_v0 }
   0x3   :  { %8 = vsyncpa [#allocation3], 0  ;;  %v39_v2 = vld [vmem:[%s187_s1 + $0x68] sm:$0xff]  ;;  %v38_v3 = vld [vmem:[%s187_s1 + $0x60] sm:$0xff]  ;;  %s108_s21 = smov [#allocation2]   ;;  %s71_s25 = sshll.u32 %s189_s3, 4  ;;  %s72_s25 = int_to_ptr.hbm [resolvable:$true] %s71_s25 }
   0x4   :  { %v37_v4 = vld [vmem:[%s187_s1 + $0x58] sm:$0xff]  ;;  %v36_v5 = vld [vmem:[%s187_s1 + $0x50] sm:$0xff]  ;;  %v35_v6 = vld [vmem:[%s187_s1 + $0x48] sm:$0xff]  ;;  %s69_s22 = sshll.u32 %s108_s21, 4  ;;  %s70_s22 = int_to_ptr.vmem [resolvable:$true] %s69_s22 }
   0x5   :  { %v34_v7 = vld [vmem:[%s187_s1 + $0x40] sm:$0xff]  ;;  %v33_v8 = vld [vmem:[%s187_s1 + $0x38] sm:$0xff]  ;;  %v32_v9 = vld [vmem:[%s187_s1 + $0x30] sm:$0xff] }
   0x6   :  { %43 = vmatpush.xpose.msra.mxu0 %v40_v1  ;;  %v31_v10 = vld [vmem:[%s187_s1 + $0x28] sm:$0xff]  ;;  %v30_v11 = vld [vmem:[%s187_s1 + $0x20] sm:$0xff]  ;;  %v29_v12 = vld [vmem:[%s187_s1 + $0x18] sm:$0xff] }
   0x7   :  { %v28_v13 = vld [vmem:[%s187_s1 + $0x10] sm:$0xff]  ;;  %v27_v14 = vld [vmem:[%s187_s1 + $0x8] sm:$0xff]  ;;  %v26_v15 = vld [vmem:[%s187_s1] sm:$0xff] }
   0x8   :  { %v25_v16 = vld [vmem:[%s186_s0] sm:$0xff] }
   0x9   :  { %v81_v17 = vld [vmem:[%s188_s2] ss:$0 sm:$0xff] }
   0xa   :  { %44 = vmatpush.xpose.msra.mxu0 %v39_v2 }
   0xe   :  { %45 = vmatpush.xpose.msra.mxu0 %v38_v3 }
  0x12   :  { %46 = vmatpush.xpose.msra.mxu0 %v37_v4 }
  0x16   :  { %47 = vmatpush.xpose.msra.mxu0 %v36_v5 }
  0x1a   :  { %48 = vmatpush.xpose.msra.mxu0 %v35_v6 }
  0x1e   :  { %49 = vmatpush.xpose.msra.mxu0 %v34_v7 }
  0x22   :  { %50 = vmatpush.xpose.msra.mxu0 %v33_v8 }
  0x26   :  { %51 = vmatpush.xpose.msra.mxu0 %v32_v9 }
  0x2a   :  { %52 = vmatpush.xpose.msra.mxu0 %v31_v10 }
  0x2e   :  { %53 = vmatpush.xpose.msra.mxu0 %v30_v11 }
  0x32   :  { %54 = vmatpush.xpose.msra.mxu0 %v29_v12 }
  0x36   :  { %55 = vmatpush.xpose.msra.mxu0 %v28_v13 }
  0x3a   :  { %56 = vmatpush.xpose.msra.mxu0 %v27_v14 }
  0x3e   :  { %57 = vmatpush.xpose.msra.mxu0 %v26_v15 }
  0x41   :  { %58 = vmatmul.f32.vlgmr.msra.gmra.mxu0 %v25_v16 }
  0xbe   :  { %v59_v18 = vpop.f32.mrf.mxu0 }
  0xbf   :  { %v62_v19 = vadd.f32 %v81_v17, %v59_v18 }
  0xc1   :  { %63 = vst [vmem:[#allocation2] sm:$0xff] %v62_v19 }
  0xc2   :  { %74 = dma.vmem_to_hbm [thread:$0]  %s70_s22, 128, %s72_s25, [#allocation3]  }
  0xc3   :  { %106 = dma.done.wait [#allocation3], 128  }
  0xc4   :  { %107 = vsyncadd [#allocation3], 4294967168 }
  0xc5   :  { %79 = vsyncpa [#allocation3], 1 }

</bundles_post_ra>
